<compile_context>
chip_gen: v5e
topology: v5e:2x2
jax: 0.10.0
libtpu: 0.0.40
codegen_flags: <defaults>
</compile_context>

<pallas_src>
import functools

import jax
import jax.numpy as jnp
from jax.experimental import pallas as pl
from jax.experimental.pallas import tpu as pltpu

BN_EPS = 1e-5


# --------------------------------------------------------------------------- #
# Kernel
# --------------------------------------------------------------------------- #
def _make_mlp_head_kernel(activation: str):
    def kernel(x_ref, w1_ref, gb_ref, w2_ref, b2_ref, o_ref, acc_ref):
        h_idx = pl.program_id(0)

        @pl.when(h_idx == 0)
        def _init():
            # Fold the final bias into the accumulator init.
            acc_ref[...] = jnp.broadcast_to(
                b2_ref[...].astype(jnp.float32), acc_ref.shape)

        # ---- Linear 1 for this hidden tile: (B, C_in) @ (C_in, tH) ----
        # (b1 is omitted: train-mode BN subtracts the batch mean, so any
        #  per-feature bias cancels exactly.)
        h = jnp.dot(x_ref[...], w1_ref[...], preferred_element_type=jnp.float32)

        # ---- BatchNorm1d (training mode, biased batch stats), folded ----
        inv_b = 1.0 / x_ref.shape[0]                       # static scalar
        mean = jnp.sum(h, axis=0, keepdims=True) * inv_b
        ex2 = jnp.sum(h * h, axis=0, keepdims=True) * inv_b
        var = ex2 - mean * mean
        gamma = gb_ref[0:1, :].astype(jnp.float32)
        beta = gb_ref[1:2, :].astype(jnp.float32)
        scale = gamma * jax.lax.rsqrt(var + BN_EPS)
        shift = beta - mean * scale
        h_bn = h * scale + shift

        # ---- Activation ----
        if activation == "relu":
            h_act = jnp.maximum(h_bn, 0.0)
        elif activation == "leaky_relu":
            h_act = jnp.where(h_bn >= 0.0, h_bn, 0.01 * h_bn)
        elif activation == "tanh":
            h_act = jnp.tanh(h_bn)
        else:
            raise AssertionError(f"{activation} is not supported yet.")

        # ---- Linear 2 partial: accumulate (B, tH) @ (tH, P_pad) ----
        acc_ref[...] += jnp.dot(h_act.astype(w2_ref.dtype), w2_ref[...],
                                preferred_element_type=jnp.float32)

        @pl.when(h_idx == pl.num_programs(0) - 1)
        def _finalize():
            o_ref[...] = acc_ref[...].astype(o_ref.dtype)

    return kernel


# --------------------------------------------------------------------------- #
# Helpers
# --------------------------------------------------------------------------- #
def _round_up(n, m):
    return ((n + m - 1) // m) * m


def _pad2d(a, rows, cols):
    r, c = a.shape
    if r == rows and c == cols:
        return a
    return jnp.pad(a, ((0, rows - r), (0, cols - c)))


def _vmem_capacity_bytes():
    """Per-generation VMEM capacity (falls back to the v7x-safe 64 MiB)."""
    try:
        info = pltpu.get_tpu_info()
        cap = getattr(info, "vmem_capacity_bytes", None)
        if cap:
            return int(cap)
    except Exception:
        pass
    return 64 << 20


def _vmem_working_set(B, c_pad, p_pad, block_h, w_item):
    """Conservative double-buffered working-set estimate (bytes)."""
    acc_item = 4
    fixed = (2 * B * c_pad * w_item            # resident x (counted x2)
             + 2 * 8 * p_pad * acc_item        # b2 (sublane-padded), x2
             + 2 * B * p_pad * acc_item        # output, x2
             + B * p_pad * acc_item)           # f32 accumulator scratch
    per_h = (2 * c_pad * w_item                # w1 tile, x2
             + 2 * p_pad * w_item              # w2 tile, x2
             + 2 * 8 * acc_item)               # gamma/beta packed tile, x2
    return fixed + block_h * per_h, fixed, per_h


def _pick_block_h(B, c_pad, p_pad, H, w_item, budget_bytes, h_cap):
    """Largest multiple-of-128 hidden tile that fits the working-set budget."""
    _, fixed, per_h = _vmem_working_set(B, c_pad, p_pad, 0, w_item)
    avail = max(0, budget_bytes - fixed)
    t_h = (avail // per_h // 128) * 128
    t_h = max(128, min(t_h, h_cap, _round_up(H, 128)))
    return int(t_h)


# --------------------------------------------------------------------------- #
# Wrapper
# --------------------------------------------------------------------------- #
def mlp_head_forward(x, w1, b1, gamma, beta, w2, b2, *, block_h=None,
                     weight_dtype=None, activation="relu"):
    del b1  # cancels exactly under train-mode BatchNorm (mean subtraction)

    B, C_in = x.shape
    H = w1.shape[1]
    P = w2.shape[1]

    if weight_dtype is None:
        weight_dtype = w1.dtype
    w_item = jnp.dtype(weight_dtype).itemsize

    c_pad = _round_up(C_in, 128)
    p_pad = _round_up(P, 128)

    # Generation-aware budgets: 128-MiB-VMEM chips (v5e/v6e) get big tiles,
    # v7x (64 MiB physical) keeps the conservative budget.
    cap = _vmem_capacity_bytes()
    if cap >= (100 << 20):
        budget_bytes, h_cap, vmem_max = 56 << 20, 8192, 100 << 20
    else:
        budget_bytes, h_cap, vmem_max = 22 << 20, 2048, 48 << 20

    if block_h is None:
        block_h = _pick_block_h(B, c_pad, p_pad, H, w_item, budget_bytes, h_cap)
    h_pad = _round_up(H, block_h)

    # Zero padding is inert: padded C_in rows / H cols / P cols contribute 0,
    # and padded BN features (gamma=beta=0, mean=var=0) produce exactly 0.
    x_p = _pad2d(x, B, c_pad).astype(weight_dtype)
    w1_p = _pad2d(w1.astype(weight_dtype), c_pad, h_pad)
    w2_p = _pad2d(w2.astype(weight_dtype), h_pad, p_pad)
    gb_p = _pad2d(
        jnp.concatenate([gamma.reshape(1, -1), beta.reshape(1, -1)],
                        axis=0).astype(jnp.float32),
        2, h_pad)
    b2_p = _pad2d(b2.astype(jnp.float32), 1, p_pad)

    grid = (h_pad // block_h,)

    used, _, _ = _vmem_working_set(B, c_pad, p_pad, block_h, w_item)
    vmem_limit = int(min(max(used + (8 << 20), 24 << 20), vmem_max))

    kernel = _make_mlp_head_kernel(activation)

    out = pl.pallas_call(
        kernel,
        out_shape=jax.ShapeDtypeStruct((B, p_pad), jnp.float32),
        grid_spec=pltpu.PrefetchScalarGridSpec(
            num_scalar_prefetch=0,
            grid=grid,
            in_specs=[
                pl.BlockSpec((B, c_pad), lambda h: (0, 0)),        # x (resident)
                pl.BlockSpec((c_pad, block_h), lambda h: (0, h)),  # w1 tile
                pl.BlockSpec((2, block_h), lambda h: (0, h)),      # gamma/beta
                pl.BlockSpec((block_h, p_pad), lambda h: (h, 0)),  # w2 tile
                pl.BlockSpec((1, p_pad), lambda h: (0, 0)),        # b2 (resident)
            ],
            out_specs=pl.BlockSpec((B, p_pad), lambda h: (0, 0)),
            scratch_shapes=[pltpu.VMEM((B, p_pad), jnp.float32)],
        ),
        compiler_params=pltpu.CompilerParams(
            dimension_semantics=("arbitrary",),
            vmem_limit_bytes=vmem_limit,
        ),
    )(x_p, w1_p, gb_p, w2_p, b2_p)

    return out[:, :P]


# --------------------------------------------------------------------------- #
# Parameter init (He, matching the PyTorch module) and pure-JAX reference
# --------------------------------------------------------------------------- #
def init_mlp_head_params(key, in_channels, mlp_scale_factor, projection_size,
                         dtype=jnp.float32):
    hidden = round(mlp_scale_factor * in_channels)
    k1, k2 = jax.random.split(key)
    w1 = (jax.random.normal(k1, (in_channels, hidden), jnp.float32)
          * jnp.sqrt(2.0 / in_channels)).astype(dtype)
    b1 = jnp.zeros((1, hidden), jnp.float32)
    gamma = jnp.ones((1, hidden), jnp.float32)
    beta = jnp.zeros((1, hidden), jnp.float32)
    w2 = (jax.random.normal(k2, (hidden, projection_size), jnp.float32)
          * jnp.sqrt(2.0 / hidden)).astype(dtype)
    b2 = jnp.zeros((1, projection_size), jnp.float32)
    return w1, b1, gamma, beta, w2, b2


def reference_forward(x, w1, b1, gamma, beta, w2, b2,
                      weight_dtype=jnp.float32):
    """Pure-JAX reference (BN in training mode, matmul inputs cast like the
    kernel so only kernel-internal differences are measured)."""
    xd = x.astype(weight_dtype)
    w1d = w1.astype(weight_dtype)
    w2d = w2.astype(weight_dtype)
    h = jnp.dot(xd, w1d, preferred_element_type=jnp.float32) + b1
    mean = jnp.mean(h, axis=0, keepdims=True)
    var = jnp.mean((h - mean) ** 2, axis=0, keepdims=True)
    h = (h - mean) / jnp.sqrt(var + BN_EPS) * gamma + beta
    h = jnp.maximum(h, 0.0)
    return jnp.dot(h.astype(weight_dtype), w2d,
                   preferred_element_type=jnp.float32) + b2


# --------------------------------------------------------------------------- #
# Self-test
# --------------------------------------------------------------------------- #
if __name__ == "__main__":
    key = jax.random.PRNGKey(0)
    kx, kp, kb1, kg, kbt, kb2, kx2, kp2, kb1b = jax.random.split(key, 9)

    # Small shapes consistent with the module: batch=8, in_channels=32,
    # mlp_scale_factor=2 -> hidden=64, projection_size=16.  f32 weights,
    # with non-trivial b1 / gamma / beta / b2 to verify the BN folding and
    # the b1-cancellation are exact.
    B, C_IN, SCALE, PROJ = 8, 32, 2, 16
    HID = round(SCALE * C_IN)
    x = jax.random.normal(kx, (B, C_IN), jnp.float32)
    w1, b1, gamma, beta, w2, b2 = init_mlp_head_params(kp, C_IN, SCALE, PROJ)
    b1 = 0.5 * jax.random.normal(kb1, (1, HID), jnp.float32)
    gamma = 1.0 + 0.2 * jax.random.normal(kg, (1, HID), jnp.float32)
    beta = 0.3 * jax.random.normal(kbt, (1, HID), jnp.float32)
    b2 = 0.2 * jax.random.normal(kb2, (1, PROJ), jnp.float32)

    out = jax.block_until_ready(
        mlp_head_forward(x, w1, b1, gamma, beta, w2, b2))
    ref = reference_forward(x, w1, b1, gamma, beta, w2, b2)
    assert out.shape == (B, PROJ)
    assert jnp.allclose(out, ref, atol=2e-3, rtol=2e-3), "mismatch (small f32)"

    # Larger test exercising the H-tiled accumulator (4 grid steps) and the
    # bf16 weight-streaming path: hidden = 1024, projection = 256.
    B2, C2, SCALE2, PROJ2 = 16, 256, 4, 256
    HID2 = round(SCALE2 * C2)
    x2 = jax.random.normal(kx2, (B2, C2), jnp.float32)
    p2 = init_mlp_head_params(kp2, C2, SCALE2, PROJ2)
    w1b, _, gammab, betab, w2b, b2b = p2
    b1b = 0.5 * jax.random.normal(kb1b, (1, HID2), jnp.float32)
    out2 = jax.block_until_ready(
        mlp_head_forward(x2, w1b, b1b, gammab, betab, w2b, b2b,
                         block_h=256, weight_dtype=jnp.bfloat16))
    ref2 = reference_forward(x2, w1b, b1b, gammab, betab, w2b, b2b,
                             weight_dtype=jnp.bfloat16)
    assert out2.shape == (B2, PROJ2)
    assert jnp.allclose(out2, ref2, atol=2e-2, rtol=2e-2), "mismatch (bf16 tiled)"

    print("KERNEL_OK")
</pallas_src>

<mosaic_0001>
module attributes {stable_mosaic.version = 11 : i64} {
  func.func @kernel(%arg0: i32, %arg1: memref<8x128xf32, #tpu.memory_space<vmem>>, %arg2: memref<128x128xf32, #tpu.memory_space<vmem>>, %arg3: memref<2x128xf32, #tpu.memory_space<vmem>>, %arg4: memref<128x128xf32, #tpu.memory_space<vmem>>, %arg5: memref<1x128xf32, #tpu.memory_space<vmem>>, %arg6: memref<8x128xf32, #tpu.memory_space<vmem>>, %arg7: memref<8x128xf32, #tpu.memory_space<vmem>>) attributes {dimension_semantics = [#tpu.dimension_semantics<arbitrary>], iteration_bounds = array<i64: 1>, scalar_prefetch = 0 : i64, scratch_operands = 1 : i64, tpu.core_type = #tpu.core_type<tc>, window_params = [{pipeline_mode = #tpu.pipeline_mode<synchronous>, transform_indices = @transform_0, window_bounds = array<i64: 8, 128>}, {transform_indices = @transform_1, window_bounds = array<i64: 128, 128>}, {transform_indices = @transform_2, window_bounds = array<i64: 2, 128>}, {transform_indices = @transform_3, window_bounds = array<i64: 128, 128>}, {pipeline_mode = #tpu.pipeline_mode<synchronous>, transform_indices = @transform_4, window_bounds = array<i64: 1, 128>}, {pipeline_mode = #tpu.pipeline_mode<synchronous>, transform_indices = @transform_5, window_bounds = array<i64: 8, 128>}]} {
    %c0_i32 = arith.constant 0 : i32
    %0 = arith.cmpi eq, %arg0, %c0_i32 : i32
    %1 = arith.extui %0 : i1 to i32
    %c0_i32_0 = arith.constant 0 : i32
    %2 = arith.cmpi ne, %1, %c0_i32_0 : i32
    scf.if %2 {
      %c0_22 = arith.constant 0 : index
      %c0_23 = arith.constant 0 : index
      %39 = vector.load %arg5[%c0_22, %c0_23] : memref<1x128xf32, #tpu.memory_space<vmem>>, vector<1x128xf32>
      %40 = vector.shape_cast %39 : vector<1x128xf32> to vector<1x128xf32>
      %41 = vector.broadcast %40 : vector<1x128xf32> to vector<8x128xf32>
      %c0_24 = arith.constant 0 : index
      %c0_25 = arith.constant 0 : index
      %42 = vector.load %arg7[%c0_24, %c0_25] : memref<8x128xf32, #tpu.memory_space<vmem>>, vector<8x128xf32>
      tpu.vector_store %arg7[%c0_24, %c0_25], %41 {strides = array<i32>} : memref<8x128xf32, #tpu.memory_space<vmem>>, vector<8x128xf32>,
    } else {
    }
    %c0 = arith.constant 0 : index
    %c0_1 = arith.constant 0 : index
    %3 = vector.load %arg1[%c0, %c0_1] : memref<8x128xf32, #tpu.memory_space<vmem>>, vector<8x128xf32>
    %c0_2 = arith.constant 0 : index
    %c0_3 = arith.constant 0 : index
    %4 = vector.load %arg2[%c0_2, %c0_3] : memref<128x128xf32, #tpu.memory_space<vmem>>, vector<128x128xf32>
    %cst = arith.constant dense<0.000000e+00> : vector<8x128xf32>
    %5 = tpu.matmul %3, %4, %cst {dimension_numbers = #tpu.dot_dimension_numbers<[1], [0], [0], [1], [0, 0, 1, 1], [], []>} : vector<8x128xf32>, vector<128x128xf32>, vector<8x128xf32> -> vector<8x128xf32>
    %cst_4 = arith.constant dense<0.000000e+00> : vector<128xf32>
    %6 = vector.multi_reduction <add>, %5, %cst_4 [0] : vector<8x128xf32> to vector<128xf32>
    %7 = vector.shape_cast %6 : vector<128xf32> to vector<1x128xf32>
    %cst_5 = arith.constant 1.250000e-01 : f32
    %8 = vector.broadcast %cst_5 : f32 to vector<1x128xf32>
    %9 = arith.mulf %7, %8 : vector<1x128xf32>
    %10 = arith.mulf %5, %5 : vector<8x128xf32>
    %cst_6 = arith.constant dense<0.000000e+00> : vector<128xf32>
    %11 = vector.multi_reduction <add>, %10, %cst_6 [0] : vector<8x128xf32> to vector<128xf32>
    %12 = vector.shape_cast %11 : vector<128xf32> to vector<1x128xf32>
    %cst_7 = arith.constant 1.250000e-01 : f32
    %13 = vector.broadcast %cst_7 : f32 to vector<1x128xf32>
    %14 = arith.mulf %12, %13 : vector<1x128xf32>
    %15 = arith.mulf %9, %9 : vector<1x128xf32>
    %16 = arith.subf %14, %15 : vector<1x128xf32>
    %c0_8 = arith.constant 0 : index
    %c0_9 = arith.constant 0 : index
    %17 = vector.load %arg3[%c0_8, %c0_9] : memref<2x128xf32, #tpu.memory_space<vmem>>, vector<1x128xf32>
    %c1 = arith.constant 1 : index
    %c0_10 = arith.constant 0 : index
    %18 = vector.load %arg3[%c1, %c0_10] : memref<2x128xf32, #tpu.memory_space<vmem>>, vector<1x128xf32>
    %cst_11 = arith.constant 9.99999974E-6 : f32
    %19 = vector.broadcast %cst_11 : f32 to vector<1x128xf32>
    %20 = arith.addf %16, %19 : vector<1x128xf32>
    %21 = math.rsqrt %20 : vector<1x128xf32>
    %22 = arith.mulf %17, %21 : vector<1x128xf32>
    %23 = arith.mulf %9, %22 : vector<1x128xf32>
    %24 = arith.subf %18, %23 : vector<1x128xf32>
    %25 = vector.broadcast %22 : vector<1x128xf32> to vector<8x128xf32>
    %26 = arith.mulf %5, %25 : vector<8x128xf32>
    %27 = vector.broadcast %24 : vector<1x128xf32> to vector<8x128xf32>
    %28 = arith.addf %26, %27 : vector<8x128xf32>
    %cst_12 = arith.constant 0.000000e+00 : f32
    %29 = vector.broadcast %cst_12 : f32 to vector<8x128xf32>
    %30 = arith.maximumf %28, %29 : vector<8x128xf32>
    %c0_13 = arith.constant 0 : index
    %c0_14 = arith.constant 0 : index
    %31 = vector.load %arg7[%c0_13, %c0_14] : memref<8x128xf32, #tpu.memory_space<vmem>>, vector<8x128xf32>
    %c0_15 = arith.constant 0 : index
    %c0_16 = arith.constant 0 : index
    %32 = vector.load %arg4[%c0_15, %c0_16] : memref<128x128xf32, #tpu.memory_space<vmem>>, vector<128x128xf32>
    %cst_17 = arith.constant dense<0.000000e+00> : vector<8x128xf32>
    %33 = tpu.matmul %30, %32, %cst_17 {dimension_numbers = #tpu.dot_dimension_numbers<[1], [0], [0], [1], [0, 0, 1, 1], [], []>} : vector<8x128xf32>, vector<128x128xf32>, vector<8x128xf32> -> vector<8x128xf32>
    %34 = arith.addf %31, %33 : vector<8x128xf32>
    %c0_18 = arith.constant 0 : index
    %c0_19 = arith.constant 0 : index
    %35 = vector.load %arg7[%c0_18, %c0_19] : memref<8x128xf32, #tpu.memory_space<vmem>>, vector<8x128xf32>
    tpu.vector_store %arg7[%c0_18, %c0_19], %34 {strides = array<i32>} : memref<8x128xf32, #tpu.memory_space<vmem>>, vector<8x128xf32>,
    %c0_i32_20 = arith.constant 0 : i32
    %36 = arith.cmpi eq, %arg0, %c0_i32_20 : i32
    %37 = arith.extui %36 : i1 to i32
    %c0_i32_21 = arith.constant 0 : i32
    %38 = arith.cmpi ne, %37, %c0_i32_21 : i32
    scf.if %38 {
      %c0_22 = arith.constant 0 : index
      %c0_23 = arith.constant 0 : index
      %39 = vector.load %arg7[%c0_22, %c0_23] : memref<8x128xf32, #tpu.memory_space<vmem>>, vector<8x128xf32>
      %c0_24 = arith.constant 0 : index
      %c0_25 = arith.constant 0 : index
      %40 = vector.load %arg6[%c0_24, %c0_25] : memref<8x128xf32, #tpu.memory_space<vmem>>, vector<8x128xf32>
      tpu.vector_store %arg6[%c0_24, %c0_25], %39 {strides = array<i32>} : memref<8x128xf32, #tpu.memory_space<vmem>>, vector<8x128xf32>,
    } else {
    }
    return
  }
  func.func @transform_0(%arg0: i32) -> (i32, i32) {
    %c0_i32 = arith.constant 0 : i32
    %c0_i32_0 = arith.constant 0 : i32
    %c0_i32_1 = arith.constant 0 : i32
    return %c0_i32, %c0_i32_0 : i32, i32
  }
  func.func @transform_1(%arg0: i32) -> (i32, i32) {
    %c0_i32 = arith.constant 0 : i32
    %c0_i32_0 = arith.constant 0 : i32
    return %c0_i32, %arg0 : i32, i32
  }
  func.func @transform_2(%arg0: i32) -> (i32, i32) {
    %c0_i32 = arith.constant 0 : i32
    %c0_i32_0 = arith.constant 0 : i32
    return %c0_i32, %arg0 : i32, i32
  }
  func.func @transform_3(%arg0: i32) -> (i32, i32) {
    %c0_i32 = arith.constant 0 : i32
    %c0_i32_0 = arith.constant 0 : i32
    return %arg0, %c0_i32 : i32, i32
  }
  func.func @transform_4(%arg0: i32) -> (i32, i32) {
    %c0_i32 = arith.constant 0 : i32
    %c0_i32_0 = arith.constant 0 : i32
    %c0_i32_1 = arith.constant 0 : i32
    return %c0_i32, %c0_i32_0 : i32, i32
  }
  func.func @transform_5(%arg0: i32) -> (i32, i32) {
    %c0_i32 = arith.constant 0 : i32
    %c0_i32_0 = arith.constant 0 : i32
    %c0_i32_1 = arith.constant 0 : i32
    return %c0_i32, %c0_i32_0 : i32, i32
  }
}

</mosaic_0001>

<bundles_post_ra>
// kernel: tpu_custom_call.1
= control target key start
LH: loop header
LB: loop body
LE: loop exit
PB: predicated region body
PF: predicated region fallthrough
CT: control target
= control target key end

     0   :  { %10 = vsyncpa [#allocation4], 0  ;;  %s420_s0 = inlined_call_operand.hbm [shape: f32[8,128], index: 0, kind: input, shape index: {}]   ;;  %s421_s1 = inlined_call_operand.hbm [shape: f32[128,128], index: 1, kind: input, shape index: {}]   ;;  %s422_s2 = inlined_call_operand.hbm [shape: f32[2,128], index: 2, kind: input, shape index: {}]   ;;  %s423_s3 = inlined_call_operand.hbm [shape: f32[128,128], index: 3, kind: input, shape index: {}]   ;;  %s424_s4 = inlined_call_operand.vmem [shape: f32[1,128], index: 4, kind: input, shape index: {}]   ;;  %s425_s5 = inlined_call_operand.hbm [shape: f32[8,128], index: 5, kind: output, shape index: {}]  }
   0x1   :  { %11 = vsyncpa [#allocation7], 0 }
   0x2   :  { %12 = vsyncpa [#allocation10], 0  ;;  %s29_s20 = sshll.u32 %s421_s1, 4  ;;  %s30_s20 = int_to_ptr.hbm [resolvable:$true] %s29_s20 }
   0x3   :  { %13 = vsyncpa [#allocation5], 0  ;;  %s365_s21 = smov [#allocation6]   ;;  %s19_s25 = sshll.u32 %s420_s0, 4  ;;  %s20_s25 = int_to_ptr.hbm [resolvable:$true] %s19_s25 }
   0x4   :  { %s31_s22 = sshll.u32 %s365_s21, 4  ;;  %s366_s26 = smov 128   ;;  %s32_s22 = int_to_ptr.vmem [resolvable:$true] %s31_s22 }
   0x5   :  { %s367_s27 = smov 8   ;;  %s368_s28 = smov [#allocation3]  }
   0x6   :  { %37 = dma.hbm_to_vmem [thread:$0]  %s30_s20, 2048, %s32_s22, [#allocation7], %s366_s26, %s366_s26, %s367_s27  }
   0x7   :  { %s21_s29 = sshll.u32 %s368_s28, 4  ;;  %s43_s7 = sshll.u32 %s422_s2, 4  ;;  %s22_s29 = int_to_ptr.vmem [resolvable:$true] %s21_s29  ;;  %s44_s7 = int_to_ptr.hbm [resolvable:$true] %s43_s7 }
   0x8   :  { %24 = dma.hbm_to_vmem [thread:$0]  %s20_s25, 128, %s22_s29, [#allocation4]  }
   0x9   :  { %s53_s9 = sshll.u32 %s423_s3, 4  ;;  %s369_s10 = smov [#allocation8]   ;;  %s54_s9 = int_to_ptr.hbm [resolvable:$true] %s53_s9 }
   0xa   :  { %s45_s11 = sshll.u32 %s369_s10, 4  ;;  %s370_s0 = smov [#allocation9]   ;;  %s46_s11 = int_to_ptr.vmem [resolvable:$true] %s45_s11 }
   0xb   :  { %48 = dma.hbm_to_vmem [thread:$0]  %s44_s7, 32, %s46_s11, [#allocation7]  }
   0xc   :  { %s55_s12 = sshll.u32 %s370_s0, 4  ;;  %s56_s12 = int_to_ptr.vmem [resolvable:$true] %s55_s12 }
   0xd   :  { %61 = dma.hbm_to_vmem [thread:$0]  %s54_s9, 2048, %s56_s12, [#allocation10], %s366_s26, %s366_s26, %s367_s27  }
   0xe   :  { %357 = dma.done.wait [#allocation4], 128  }
   0xf   :  { %358 = vsyncadd [#allocation4], 4294967168 }
  0x10   :  { %359 = dma.done.wait [#allocation7], 2080  }
  0x11   :  { %360 = vsyncadd [#allocation7], 4294965216 }
  0x12   :  { %361 = dma.done.wait [#allocation10], 2048  }
  0x13   :  { %362 = vsyncadd [#allocation10], 4294965248  ;;  %v105_v0 = vld [vmem:[#allocation6 + $0x78] sm:$0xff]  ;;  %v104_v1 = vld [vmem:[#allocation6 + $0x70] sm:$0xff]  ;;  %s371_s13 = smov [#allocation11]   ;;  %s215_s17 = sshll.u32 %s425_s5, 4  ;;  %s216_s17 = int_to_ptr.hbm [resolvable:$true] %s215_s17 }
  0x14   :  { %106 = vmatpush.msra.mxu0 %v105_v0  ;;  %v103_v2 = vld [vmem:[#allocation6 + $0x68] sm:$0xff]  ;;  %v102_v3 = vld [vmem:[#allocation6 + $0x60] sm:$0xff]  ;;  %v101_v4 = vld [vmem:[#allocation6 + $0x58] sm:$0xff]  ;;  %s213_s14 = sshll.u32 %s371_s13, 4  ;;  %s214_s14 = int_to_ptr.vmem [resolvable:$true] %s213_s14 }
  0x15   :  { %v100_v5 = vld [vmem:[#allocation6 + $0x50] sm:$0xff]  ;;  %v99_v6 = vld [vmem:[#allocation6 + $0x48] sm:$0xff]  ;;  %v98_v7 = vld [vmem:[#allocation6 + $0x40] sm:$0xff] }
  0x16   :  { %107 = vmatpush.msra.mxu0 %v104_v1  ;;  %v97_v8 = vld [vmem:[#allocation6 + $0x38] sm:$0xff]  ;;  %v96_v9 = vld [vmem:[#allocation6 + $0x30] sm:$0xff]  ;;  %v95_v10 = vld [vmem:[#allocation6 + $0x28] sm:$0xff] }
  0x17   :  { %v94_v11 = vld [vmem:[#allocation6 + $0x20] sm:$0xff]  ;;  %v93_v12 = vld [vmem:[#allocation6 + $0x18] sm:$0xff]  ;;  %v92_v13 = vld [vmem:[#allocation6 + $0x10] sm:$0xff] }
  0x18   :  { %108 = vmatpush.msra.mxu0 %v103_v2  ;;  %v91_v14 = vld [vmem:[#allocation6 + $0x8] sm:$0xff]  ;;  %v90_v15 = vld [vmem:[#allocation6] sm:$0xff]  ;;  %v89_v16 = vld [vmem:[#allocation3] sm:$0xff] }
  0x19   :  { %v180_v17 = vld [vmem:[#allocation9 + $0x78] sm:$0xff]  ;;  %v179_v18 = vld [vmem:[#allocation9 + $0x70] sm:$0xff]  ;;  %v178_v19 = vld [vmem:[#allocation9 + $0x68] sm:$0xff] }
  0x1a   :  { %109 = vmatpush.msra.mxu0 %v102_v3  ;;  %181 = vmatpush.msra.mxu1 %v180_v17  ;;  %v177_v20 = vld [vmem:[#allocation9 + $0x60] sm:$0xff]  ;;  %v176_v21 = vld [vmem:[#allocation9 + $0x58] sm:$0xff]  ;;  %v175_v22 = vld [vmem:[#allocation9 + $0x50] sm:$0xff] }
  0x1b   :  { %v174_v23 = vld [vmem:[#allocation9 + $0x48] sm:$0xff]  ;;  %v173_v27 = vld [vmem:[#allocation9 + $0x40] sm:$0xff]  ;;  %v172_v30 = vld [vmem:[#allocation9 + $0x38] sm:$0xff] }
  0x1c   :  { %110 = vmatpush.msra.mxu0 %v101_v4  ;;  %182 = vmatpush.msra.mxu1 %v179_v18  ;;  %v171_v33 = vld [vmem:[#allocation9 + $0x30] sm:$0xff]  ;;  %v170_v36 = vld [vmem:[#allocation9 + $0x28] sm:$0xff]  ;;  %v169_v39 = vld [vmem:[#allocation9 + $0x20] sm:$0xff] }
  0x1d   :  { %v168_v42 = vld [vmem:[#allocation9 + $0x18] sm:$0xff]  ;;  %v167_v43 = vld [vmem:[#allocation9 + $0x10] sm:$0xff]  ;;  %v166_v46 = vld [vmem:[#allocation9 + $0x8] sm:$0xff] }
  0x1e   :  { %111 = vmatpush.msra.mxu0 %v100_v5  ;;  %183 = vmatpush.msra.mxu1 %v178_v19  ;;  %v165_v49 = vld [vmem:[#allocation9] sm:$0xff]  ;;  %v143_v57 = vld [vmem:[#allocation8] sm:$0x1]  ;;  %v144_v61 = vld [vmem:[#allocation8 + $0x1] sm:$0x1] }
  0x1f   :  { %v234_v5 = vld [vmem:[%s424_s4] ss:$0 sm:$0xff] }
  0x20   :  { %112 = vmatpush.msra.mxu0 %v99_v6  ;;  %184 = vmatpush.msra.mxu1 %v177_v20 }
  0x22   :  { %113 = vmatpush.msra.mxu0 %v98_v7  ;;  %185 = vmatpush.msra.mxu1 %v176_v21 }
  0x24   :  { %114 = vmatpush.msra.mxu0 %v97_v8  ;;  %186 = vmatpush.msra.mxu1 %v175_v22 }
  0x26   :  { %115 = vmatpush.msra.mxu0 %v96_v9  ;;  %187 = vmatpush.msra.mxu1 %v174_v23 }
  0x28   :  { %116 = vmatpush.msra.mxu0 %v95_v10  ;;  %188 = vmatpush.msra.mxu1 %v173_v27 }
  0x2a   :  { %117 = vmatpush.msra.mxu0 %v94_v11  ;;  %189 = vmatpush.msra.mxu1 %v172_v30 }
  0x2c   :  { %118 = vmatpush.msra.mxu0 %v93_v12  ;;  %190 = vmatpush.msra.mxu1 %v171_v33 }
  0x2e   :  { %119 = vmatpush.msra.mxu0 %v92_v13  ;;  %191 = vmatpush.msra.mxu1 %v170_v36 }
  0x30   :  { %120 = vmatpush.msra.mxu0 %v91_v14  ;;  %192 = vmatpush.msra.mxu1 %v169_v39 }
  0x32   :  { %121 = vmatpush.msra.mxu0 %v90_v15  ;;  %193 = vmatpush.msra.mxu1 %v168_v42 }
  0x33   :  { %122 = vmatmul.f32.vlgmr.msra.gmra.mxu0 %v89_v16 }
  0x34   :  { %194 = vmatpush.msra.mxu1 %v167_v43 }
  0x36   :  { %195 = vmatpush.msra.mxu1 %v166_v46 }
  0x38   :  { %196 = vmatpush.msra.mxu1 %v165_v49 }
  0xb0   :  { %v123_v24 = vpop.f32.mrf.mxu0 }
  0xb1   :  { %v126_v25 = vrot.slane %v123_v24, 4  ;;  %v133_v26 = vmul.f32 %v123_v24, %v123_v24 }
  0xb3   :  { %v127_v28 = vadd.f32 %v126_v25, %v123_v24  ;;  %v134_v29 = vrot.slane %v133_v26, 4 }
  0xb5   :  { %v128_v31 = vrot.slane %v127_v28, 2  ;;  %v135_v32 = vadd.f32 %v134_v29, %v133_v26 }
  0xb7   :  { %v129_v34 = vadd.f32 %v128_v31, %v127_v28  ;;  %v136_v35 = vrot.slane %v135_v32, 2 }
  0xb9   :  { %v130_v37 = vrot.slane %v129_v34, 1  ;;  %v137_v38 = vadd.f32 %v136_v35, %v135_v32 }
  0xbb   :  { %v131_v40 = vadd.f32 %v130_v37, %v129_v34  ;;  %v138_v41 = vrot.slane %v137_v38, 1 }
  0xbd   :  { %v132_v44 = vmul.f32 0.125, %v131_v40  ;;  %v139_v45 = vadd.f32 %v138_v41, %v137_v38 }
  0xbf   :  { %v140_v47 = vmul.f32 0.125, %v139_v45  ;;  %v141_v48 = vmul.f32 %v132_v44, %v132_v44 }
  0xc1   :  { %v142_v50 = vsub.f32 %v140_v47, %v141_v48 }
  0xc3   :  { %v145_v51 = vadd.f32 1e-05, %v142_v50 }
  0xc5   :  { %235 = vrsqrt.f32 %v145_v51  ;;  %vm152_vm1 = vweird.f32 %v145_v51 }
  0xcb   :  { %v236_v52 = vpop.eup %235 }
  0xcc   :  { %v147_v53 = vmul.f32 %v236_v52, %v145_v51  ;;  %vm153_vm0 = vweird.f32 %v236_v52 }
  0xcd   :  { %vm154_vm2 = vmor %vm152_vm1, %vm153_vm0 }
  0xce   :  { %v148_v54 = vmul.f32 %v236_v52, %v147_v53 }
  0xd0   :  { %v149_v55 = vmul.f32 0.5, %v148_v54 }
  0xd2   :  { %v150_v56 = vsub.f32 1.5, %v149_v55 }
  0xd4   :  { %v151_v58 = vmul.f32 %v236_v52, %v150_v56 }
  0xd6   :  { %v155_v59 = vsel %vm154_vm2, %v236_v52, %v151_v58 }
  0xd7   :  { %v156_v60 = vmul.f32 %v155_v59, %v143_v57 }
  0xd9   :  { %v159_v62 = vperm.slane %v156_v60, 0  ;;  %v157_v63 = vmul.f32 %v156_v60, %v132_v44 }
  0xdb   :  { %v158_v0 = vsub.f32 %v144_v61, %v157_v63  ;;  %v160_v1 = vmul.f32 %v159_v62, %v123_v24 }
  0xdd   :  { %v161_v2 = vperm.slane %v158_v0, 0 }
  0xdf   :  { %v162_v3 = vadd.f32 %v161_v2, %v160_v1 }
  0xe1   :  { %v163_v4 = vmax.f32 %v162_v3, 0.0 }
  0xe3   :  { %197 = vmatmul.f32.vlgmr.msra.gmra.mxu1 %v163_v4 }
 0x160   :  { %v198_v6 = vpop.f32.mrf.mxu1 }
 0x161   :  { %v201_v7 = vadd.f32 %v234_v5, %v198_v6 }
 0x163   :  { %207 = vst [vmem:[#allocation11] sm:$0xff] %v201_v7 }
 0x164   :  { %218 = dma.vmem_to_hbm [thread:$0]  %s214_s14, 128, %s216_s17, [#allocation5]  }
 0x165   :  { %363 = dma.done.wait [#allocation5], 128  }
 0x166   :  { %364 = vsyncadd [#allocation5], 4294967168 }
 0x167   :  { %223 = vsyncpa [#allocation4], 1 }
 0x168   :  { %224 = vsyncpa [#allocation7], 1 }
 0x169   :  { %225 = vsyncpa [#allocation10], 1 }
 0x16a   :  { %226 = vsyncpa [#allocation5], 1 }

</bundles_post_ra>
